<compile_context>
chip_gen: v5e
topology: v5e:2x2
jax: 0.10.0
libtpu: 0.0.40
codegen_flags: <defaults>
</compile_context>

<pallas_src>
import functools

import jax
import jax.numpy as jnp
from jax import lax
from jax.experimental import pallas as pl
from jax.experimental.pallas import tpu as pltpu


def _convrl_kernel(w_ref, b_ref, x_ref, o_ref):
    # w_ref: (Cout, K) resident weights; b_ref: (Cout, 1) bias.
    # x_ref: (1, K, T) space-to-depth input tile; o_ref: (1, Cout, T) output tile.
    acc = jnp.dot(w_ref[...], x_ref[0], preferred_element_type=jnp.float32)
    acc = acc + b_ref[...]                      # (Cout, 1) broadcasts along lanes
    o_ref[0] = jnp.maximum(acc, 0.0).astype(o_ref.dtype)


def _pick_spatial_tile(S, K, Cout):
    """Largest lane tile T (and padded extent Sp) under a conservative VMEM budget."""
    LANE = 128
    # Double-buffered f32 input + output bytes per spatial column.
    bytes_per_col = 2 * 4 * (K + Cout)
    budget = 24 * 1024 * 1024          # fits v7x's 32 MiB default scoped VMEM
    t_cap = max(LANE, (budget // bytes_per_col) // LANE * LANE)
    t_cap = min(t_cap, 16 * 1024)      # keep several grid steps for megacore/pipelining
    if S <= t_cap:
        return S, S                    # single full-extent spatial block (always legal)
    T = t_cap
    for cand in range(t_cap, LANE - 1, -LANE):   # prefer a 128-multiple that divides S
        if S % cand == 0:
            T = cand
            break
    Sp = pl.cdiv(S, T) * T
    return T, Sp


@functools.partial(jax.jit, static_argnames=("kernel", "stride", "compute_dtype"))
def conv_rl(x, weight, bias, *, kernel=2, stride=2, compute_dtype=None):
    """x: (N, C, H, W) f32; weight: (Cout, C, kh, kw); bias: (Cout,)."""
    assert kernel == stride, "this kernel specializes the kernel == stride case"
    N, C, H, W = x.shape
    Cout, Cin, kh, kw = weight.shape
    assert Cin == C and kh == kernel and kw == kernel
    Ho = (H - kernel) // stride + 1
    Wo = (W - kernel) // stride + 1
    K = C * kernel * kernel
    S = Ho * Wo

    # Space-to-depth: (N, C, H, W) -> (N, K, Ho*Wo).  Only data rearrangement outside
    # the kernel; the output needs none (lands in NCHW modulo a free reshape).
    xs = x[:, :, : Ho * stride, : Wo * stride]
    xs = xs.reshape(N, C, Ho, kernel, Wo, kernel)
    xs = xs.transpose(0, 1, 3, 5, 2, 4).reshape(N, K, S)

    w2 = weight.reshape(Cout, K)       # (c, i, j) ordering matches xs' K axis
    brow = bias.reshape(Cout, 1).astype(jnp.float32)

    if compute_dtype is not None:      # e.g. jnp.bfloat16 on v6e/v7x; accum stays f32
        xs = xs.astype(compute_dtype)
        w2 = w2.astype(compute_dtype)

    T, Sp = _pick_spatial_tile(S, K, Cout)
    if Sp != S:
        xs = jnp.pad(xs, ((0, 0), (0, 0), (0, Sp - S)))

    grid = (N, Sp // T)
    flops = 2 * N * S * K * Cout
    bytes_accessed = (xs.size * xs.dtype.itemsize + w2.size * w2.dtype.itemsize
                      + Cout * 4 + N * Cout * Sp * 4)

    out = pl.pallas_call(
        _convrl_kernel,
        out_shape=jax.ShapeDtypeStruct((N, Cout, Sp), x.dtype),
        grid_spec=pltpu.PrefetchScalarGridSpec(
            num_scalar_prefetch=0,
            grid=grid,
            in_specs=[
                pl.BlockSpec((Cout, K), lambda n, s: (0, 0)),   # resident weights
                pl.BlockSpec((Cout, 1), lambda n, s: (0, 0)),   # resident bias
                pl.BlockSpec((1, K, T), lambda n, s: (n, 0, s)),
            ],
            out_specs=pl.BlockSpec((1, Cout, T), lambda n, s: (n, 0, s)),
        ),
        compiler_params=pltpu.CompilerParams(
            dimension_semantics=("parallel", "parallel"),
        ),
        cost_estimate=pl.CostEstimate(
            flops=flops, transcendentals=0, bytes_accessed=bytes_accessed),
    )(w2, brow, xs)

    out = out[:, :, :S]                          # drop spatial padding (if any)
    return out.reshape(N, Cout, Ho, Wo)          # free reshape, no transpose


def _init_params(key, in_channel, out_channel, kernel):
    # Deterministic init mirroring PyTorch Conv2d default (uniform +/- 1/sqrt(fan_in)).
    fan_in = in_channel * kernel * kernel
    bound = 1.0 / jnp.sqrt(jnp.float32(fan_in))
    kw_, kb_ = jax.random.split(key)
    weight = jax.random.uniform(
        kw_, (out_channel, in_channel, kernel, kernel),
        minval=-bound, maxval=bound, dtype=jnp.float32)
    bias = jax.random.uniform(
        kb_, (out_channel,), minval=-bound, maxval=bound, dtype=jnp.float32)
    return weight, bias


if __name__ == "__main__":
    key = jax.random.PRNGKey(0)
    kx, kp = jax.random.split(key)

    N, Cin, H, W = 2, 4, 16, 16
    Cout, kernel, stride = 8, 2, 2

    x = jax.random.normal(kx, (N, Cin, H, W), dtype=jnp.float32)
    weight, bias = _init_params(kp, Cin, Cout, kernel)

    y = conv_rl(x, weight, bias, kernel=kernel, stride=stride)
    y = jax.block_until_ready(y)

    # Reference check against XLA's conv (NCHW, OIHW) + ReLU.
    ref = lax.conv_general_dilated(
        x, weight, window_strides=(stride, stride), padding="VALID",
        dimension_numbers=("NCHW", "OIHW", "NCHW"))
    ref = jnp.maximum(ref + bias.reshape(1, Cout, 1, 1), 0.0)

    assert y.shape == (N, Cout, H // stride, W // stride), y.shape
    assert jnp.allclose(y, ref, atol=1e-5, rtol=1e-5), float(jnp.max(jnp.abs(y - ref)))

    print("KERNEL_OK")
</pallas_src>

<mosaic_0001>
module attributes {stable_mosaic.version = 11 : i64} {
  func.func @_convrl_kernel(%arg0: i32, %arg1: i32, %arg2: memref<8x16xf32, #tpu.memory_space<vmem>>, %arg3: memref<8x1xf32, #tpu.memory_space<vmem>>, %arg4: memref<1x16x64xf32, #tpu.memory_space<vmem>>, %arg5: memref<1x8x64xf32, #tpu.memory_space<vmem>>) attributes {dimension_semantics = [#tpu.dimension_semantics<parallel>, #tpu.dimension_semantics<parallel>], iteration_bounds = array<i64: 2, 1>, scalar_prefetch = 0 : i64, scratch_operands = 0 : i64, tpu.core_type = #tpu.core_type<tc>, window_params = [{pipeline_mode = #tpu.pipeline_mode<synchronous>, transform_indices = @transform_0, window_bounds = array<i64: 8, 16>}, {pipeline_mode = #tpu.pipeline_mode<synchronous>, transform_indices = @transform_1, window_bounds = array<i64: 8, 1>}, {transform_indices = @transform_2, window_bounds = array<i64: 1, 16, 64>}, {transform_indices = @transform_3, window_bounds = array<i64: 1, 8, 64>}]} {
    %c0 = arith.constant 0 : index
    %c0_0 = arith.constant 0 : index
    %0 = vector.load %arg2[%c0, %c0_0] : memref<8x16xf32, #tpu.memory_space<vmem>>, vector<8x16xf32>
    %c0_1 = arith.constant 0 : index
    %c0_2 = arith.constant 0 : index
    %c0_3 = arith.constant 0 : index
    %1 = vector.load %arg4[%c0_1, %c0_2, %c0_3] : memref<1x16x64xf32, #tpu.memory_space<vmem>>, vector<1x16x64xf32>
    %2 = vector.shape_cast %1 : vector<1x16x64xf32> to vector<16x64xf32>
    %cst = arith.constant dense<0.000000e+00> : vector<8x64xf32>
    %3 = tpu.matmul %0, %2, %cst {dimension_numbers = #tpu.dot_dimension_numbers<[1], [0], [0], [1], [0, 0, 1, 1], [], []>} : vector<8x16xf32>, vector<16x64xf32>, vector<8x64xf32> -> vector<8x64xf32>
    %c0_4 = arith.constant 0 : index
    %c0_5 = arith.constant 0 : index
    %4 = vector.load %arg3[%c0_4, %c0_5] : memref<8x1xf32, #tpu.memory_space<vmem>>, vector<8x1xf32>
    %5 = vector.broadcast %4 : vector<8x1xf32> to vector<8x64xf32>
    %6 = arith.addf %3, %5 : vector<8x64xf32>
    %cst_6 = arith.constant 0.000000e+00 : f32
    %7 = vector.broadcast %cst_6 : f32 to vector<8x64xf32>
    %8 = arith.maximumf %6, %7 : vector<8x64xf32>
    %c0_7 = arith.constant 0 : index
    %c0_8 = arith.constant 0 : index
    %c0_9 = arith.constant 0 : index
    %9 = vector.load %arg5[%c0_7, %c0_8, %c0_9] : memref<1x8x64xf32, #tpu.memory_space<vmem>>, vector<1x8x64xf32>
    %10 = vector.shape_cast %9 : vector<1x8x64xf32> to vector<8x64xf32>
    %11 = vector.shape_cast %8 : vector<8x64xf32> to vector<1x8x64xf32>
    tpu.vector_store %arg5[%c0_7, %c0_8, %c0_9], %11 {strides = array<i32>} : memref<1x8x64xf32, #tpu.memory_space<vmem>>, vector<1x8x64xf32>,
    return
  }
  func.func @transform_0(%arg0: i32, %arg1: i32) -> (i32, i32) {
    %c0_i32 = arith.constant 0 : i32
    %c0_i32_0 = arith.constant 0 : i32
    %c0_i32_1 = arith.constant 0 : i32
    return %c0_i32, %c0_i32_0 : i32, i32
  }
  func.func @transform_1(%arg0: i32, %arg1: i32) -> (i32, i32) {
    %c0_i32 = arith.constant 0 : i32
    %c0_i32_0 = arith.constant 0 : i32
    %c0_i32_1 = arith.constant 0 : i32
    return %c0_i32, %c0_i32_0 : i32, i32
  }
  func.func @transform_2(%arg0: i32, %arg1: i32) -> (i32, i32, i32) {
    %c0_i32 = arith.constant 0 : i32
    %c0_i32_0 = arith.constant 0 : i32
    return %arg0, %c0_i32, %arg1 : i32, i32, i32
  }
  func.func @transform_3(%arg0: i32, %arg1: i32) -> (i32, i32, i32) {
    %c0_i32 = arith.constant 0 : i32
    %c0_i32_0 = arith.constant 0 : i32
    return %arg0, %c0_i32, %arg1 : i32, i32, i32
  }
}

</mosaic_0001>

<bundles_post_ra>
// kernel: conv_rl.1
= control target key start
LH: loop header
LB: loop body
LE: loop exit
PB: predicated region body
PF: predicated region fallthrough
CT: control target
= control target key end

     0   :  { %s396_s12 = smov 0   ;;  %s398_s13 = smov 0   ;;  %s435_s0 = inlined_call_operand.vmem [shape: f32[8,16], index: 0, kind: input, shape index: {}]   ;;  %s436_s1 = inlined_call_operand.vmem [shape: f32[8,1], index: 1, kind: input, shape index: {}]   ;;  %s437_s2 = inlined_call_operand.vmem [shape: f32[2,16,64], index: 2, kind: input, shape index: {}]   ;;  %s438_s3 = inlined_call_operand.vmem [shape: f32[2,8,64], index: 3, kind: output, shape index: {}]  }
   0x1   :  { %s400_s14 = smov 0  }
   0x2 LB: > { %s25_s15 = sadd.s32 1, %s369_s13  ;;  %p317_p0 = scmp.ge.s32.totalorder %s373_s14, 1  ;;  %s373_s14 = sphi %s400_s14, %s13_s14   ;;  %s369_s13 = sphi %s398_s13, %s440_s13   ;;  %s365_s12 = sphi %s396_s12, %s439_s12  }
   0x3   : > { %p27_p1 = scmp.ge.s32.totalorder %s25_s15, 2  ;;  %p156_p2 = scmp.lt.s32.totalorder %s373_s14, 3 }
   0x5   : > { %s442_s15 = smov (%p27_p1, %s25_s15), 0  ;;  %p157_p3 = pnand %p317_p0, %p156_p2 }
   0x6   : > { %p185_p4 = scmp.lt.s32.totalorder (!%p157_p3), %s365_s12, 1 }
   0x7   : > { %160 = sbr.rel (%p157_p3) target bundleno = 150 (0x96), region = 32 }
   0xc   : > { %v203_v0 = vld [vmem:[%s436_s1] sm:$0xff]  ;;  %v375_v1 = vmov 0   ;;  %s444_s12 = smov (!%p185_p4, %s365_s12), 1  ;;  %vm209_vm0 = vcmask 130048   ;;  %vm234_vm1 = vcmask 523264  }
   0xd   : > { %350 = vset.pattern.permute.xlu0 %v375_v1  ;;  %s324_s18 = sshll.u32 %s444_s12, 4  ;;  %v200_v4 = vld [vmem:[%s435_s0] sm:$0xff]  ;;  %s320_s24 = sshll.u32 %s444_s12, 3 }
   0xe   : > { %206 = vperm.xlu0 %350, %v203_v0   ;;  %s192_s21 = scalar_lea.vmem %s437_s2, %s324_s18  ;;  %s199_s27 = scalar_lea.vmem %s438_s3, %s320_s24 }
   0xf   : > { %v202_v2 = vld [vmem:[%s192_s21 + $0x8] sm:$0xff]  ;;  %v201_v3 = vld [vmem:[%s192_s21] sm:$0xff] }
  0x10   : > { %227 = vmatpush.msra.mxu0 %v202_v2 }
  0x12   : > { %228 = vmatpush.msra.mxu0 %v201_v3 }
  0x13   : > { %321 = vmatmul.msk.f32.vlgmr.msra.gmra.mxu0 %vm209_vm0, %v200_v4 }
  0x80   : > { %v207_v5 = vpop.permute.xlu0 %206 }
  0x90   : > { %v230_v6 = vpop.f32.mrf.mxu0 }
  0x91   : > { %v231_v7 = vadd.f32 %v230_v6, %v207_v5 }
  0x93   : > { %v233_v8 = vmax.f32 %v231_v7, 0.0 }
  0x95   : > { %235 = vst.msk [vmem:[%s199_s27] sm:$0xff] %vm234_vm1, %v233_v8 }
  0x96 PF: > { %s13_s14 = sadd.s32 1, %s373_s14   ;;  %s439_s12 = smov %s369_s13 }
  0x97   : > { %p10_p5 = scmp.ge.s32.totalorder %s13_s14, 4   ;;  %s440_s13 = smov %s442_s15 }
  0x99   :  { %12 = sbr.rel (!%p10_p5) target bundleno = 2 (0x2), region = 62 }

</bundles_post_ra>
